<compile_context>
chip_gen: v7x
topology: tpu7x:2x2x1
jax: 0.10.0
libtpu: 0.0.40
codegen_flags: <defaults>
</compile_context>

<pallas_src>
import jax
import jax.numpy as jnp
from jax.experimental import pallas as pl
from jax.experimental.pallas import tpu as pltpu


def _round_up(n, m):
    return ((n + m - 1) // m) * m


def _cdiv(a, b):
    return -(-a // b)


def _qnet_kernel(x_ref, w1_ref, b1_ref, w2_ref, b2_ref,
                 w3_ref, b3_ref, w4_ref, b4_ref, o_ref):
    """Whole MLP hot path: 4 MXU matmuls (f32 accumulation) + bias/ReLU on VPU.

    x arrives in its native f32 and is cast to the matmul operand dtype in
    VMEM (no separate XLA cast pass over x in the wrapper)."""
    cdt = w1_ref.dtype  # matmul operand dtype (bf16 default, f32 for exact)

    x = x_ref[...].astype(cdt)

    h = jnp.dot(x, w1_ref[...], preferred_element_type=jnp.float32)
    h = jnp.maximum(h + b1_ref[...], 0.0).astype(cdt)

    h = jnp.dot(h, w2_ref[...], preferred_element_type=jnp.float32)
    h = jnp.maximum(h + b2_ref[...], 0.0).astype(cdt)

    h = jnp.dot(h, w3_ref[...], preferred_element_type=jnp.float32)
    h = jnp.maximum(h + b3_ref[...], 0.0).astype(cdt)

    out = jnp.dot(h, w4_ref[...], preferred_element_type=jnp.float32)
    o_ref[...] = (out + b4_ref[...]).astype(o_ref.dtype)


def prepare_qnet_params(params, compute_dtype=jnp.bfloat16):
    """One-time weight prep — call when params are created/updated, NOT per
    forward.  Casts matmul operands to compute_dtype and zero-pads only the
    64-wide hidden layer up to 128 lanes so the layer-3 output / layer-4 LHS
    is lane-dense.  Padding is exact: zero weight columns + zero bias pad
    propagate zeros through ReLU.  The action_dim output is NOT padded."""
    h3 = params["w3"].shape[1]           # 64
    h3p = _round_up(h3, 128)             # 128

    w1 = params["w1"].astype(compute_dtype)
    w2 = params["w2"].astype(compute_dtype)
    w3 = jnp.pad(params["w3"], ((0, 0), (0, h3p - h3))).astype(compute_dtype)
    w4 = jnp.pad(params["w4"], ((0, h3p - h3), (0, 0))).astype(compute_dtype)

    b1 = params["b1"].astype(jnp.float32)
    b2 = params["b2"].astype(jnp.float32)
    b3 = jnp.pad(params["b3"], ((0, 0), (0, h3p - h3))).astype(jnp.float32)
    b4 = params["b4"].astype(jnp.float32)

    return (w1, b1, w2, b2, w3, b3, w4, b4)


def qnet_forward(x, prepared, *, max_tile=2048):
    """x: (B, obs_dim) f32.  prepared: output of prepare_qnet_params()."""
    B, obs_dim = x.shape
    (w1, b1, w2, b2, w3, b3, w4, b4) = prepared
    action_dim = w4.shape[1]

    if B <= max_tile:
        # Small/medium batch: single no-grid invocation.  Every operand is one
        # full-array VMEM block (explicit memory space), no pipeline overhead.
        vmem = lambda: pl.BlockSpec(memory_space=pltpu.MemorySpace.VMEM)
        return pl.pallas_call(
            _qnet_kernel,
            out_shape=jax.ShapeDtypeStruct((B, action_dim), jnp.float32),
            in_specs=[vmem() for _ in range(9)],
            out_specs=vmem(),
        )(x, w1, b1, w2, b2, w3, b3, w4, b4)

    # Large batch: 1-D grid over batch rows with the FEWEST possible steps
    # (>= 2 so the "parallel" axis can shard across the two v7x TensorCores).
    # Per-step overhead (~0.35 us) dwarfs the per-tile MXU work, so big tiles
    # win on every generation; VMEM footprint stays in the low MiB.
    n_steps = max(2, _cdiv(B, max_tile))
    batch_tile = _round_up(_cdiv(B, n_steps), 8)
    Bp = batch_tile * n_steps

    xq = x
    if Bp != B:
        # Rare (tile doesn't divide B); one small pad pass over x only.
        xq = jnp.pad(x, ((0, Bp - B), (0, 0)))

    def row_map(i):
        return (i, 0)

    def const_map(i):
        return (0, 0)

    out = pl.pallas_call(
        _qnet_kernel,
        out_shape=jax.ShapeDtypeStruct((Bp, action_dim), jnp.float32),
        grid_spec=pltpu.PrefetchScalarGridSpec(
            num_scalar_prefetch=0,
            grid=(n_steps,),
            in_specs=[
                pl.BlockSpec((batch_tile, obs_dim), row_map),   # x tile (f32)
                # Weights/biases: constant block index -> fetched for step 0
                # and recognized as unchanged on later steps (no re-DMA);
                # total footprint ~0.2 MiB so no vmem_limit override needed.
                pl.BlockSpec(w1.shape, const_map), pl.BlockSpec(b1.shape, const_map),
                pl.BlockSpec(w2.shape, const_map), pl.BlockSpec(b2.shape, const_map),
                pl.BlockSpec(w3.shape, const_map), pl.BlockSpec(b3.shape, const_map),
                pl.BlockSpec(w4.shape, const_map), pl.BlockSpec(b4.shape, const_map),
            ],
            # Narrow (action_dim-wide) output block: last dim equals the full
            # array dim, so this is legal; masked stores here are noise vs the
            # 128-lane f32 writeback it replaces.
            out_specs=pl.BlockSpec((batch_tile, action_dim), row_map),
        ),
        compiler_params=pltpu.CompilerParams(
            dimension_semantics=("parallel",)),
    )(xq, w1, b1, w2, b2, w3, b3, w4, b4)

    return out if Bp == B else out[:B]


def init_qnet_params(key, obs_dim, action_dim):
    """Deterministic synthetic init mirroring the PyTorch __init__ semantics:
    hidden biases = 0.1; last layer weight & bias ~ U(-0.003, 0.003);
    hidden weights ~ U(-1/sqrt(fan_in), 1/sqrt(fan_in))."""
    dims = [obs_dim, 256, 128, 64, action_dim]
    keys = jax.random.split(key, 8)
    params = {}
    for li in range(3):  # first three Linear layers
        fan_in = dims[li]
        bound = 1.0 / float(jnp.sqrt(jnp.float32(fan_in)))
        params[f"w{li+1}"] = jax.random.uniform(
            keys[li], (dims[li], dims[li + 1]), jnp.float32, -bound, bound)
        params[f"b{li+1}"] = jnp.full((1, dims[li + 1]), 0.1, jnp.float32)
    params["w4"] = jax.random.uniform(
        keys[3], (dims[3], dims[4]), jnp.float32, -0.003, 0.003)
    params["b4"] = jax.random.uniform(
        keys[4], (1, dims[4]), jnp.float32, -0.003, 0.003)
    return params


def qnet_reference(x, params):
    h = jnp.maximum(x @ params["w1"] + params["b1"], 0.0)
    h = jnp.maximum(h @ params["w2"] + params["b2"], 0.0)
    h = jnp.maximum(h @ params["w3"] + params["b3"], 0.0)
    return h @ params["w4"] + params["b4"]


if __name__ == "__main__":
    key = jax.random.PRNGKey(0)
    k_param, k_x1, k_x2 = jax.random.split(key, 3)

    obs_dim, action_dim = 16, 4
    params = init_qnet_params(k_param, obs_dim, action_dim)

    # Prepared (cast/padded) params are built ONCE, outside the hot path.
    prep_f32 = prepare_qnet_params(params, compute_dtype=jnp.float32)
    prep_bf16 = prepare_qnet_params(params, compute_dtype=jnp.bfloat16)

    # 1) Action-selection-sized batch -> no-grid path, f32 operands.
    B_small = 8
    x_small = jax.random.normal(k_x1, (B_small, obs_dim), jnp.float32)
    out_small = jax.block_until_ready(qnet_forward(x_small, prep_f32))
    ref_small = qnet_reference(x_small, params)
    assert out_small.shape == (B_small, action_dim)
    assert jnp.allclose(out_small, ref_small, atol=2e-3, rtol=2e-3), \
        "f32 kernel mismatch vs reference"

    # 2) Replay-sized batch -> gridded path with exactly 2 parallel steps
    #    (max_tile lowered here only to exercise the gridded code path).
    B_big = 512
    x_big = jax.random.normal(k_x2, (B_big, obs_dim), jnp.float32)
    out_big = jax.block_until_ready(
        qnet_forward(x_big, prep_bf16, max_tile=256))
    ref_big = qnet_reference(x_big, params)
    assert out_big.shape == (B_big, action_dim)
    assert jnp.allclose(out_big, ref_big, atol=3e-2, rtol=3e-2), \
        "bf16 kernel mismatch vs reference"

    print("KERNEL_OK")
</pallas_src>

<mosaic_0001>
module attributes {stable_mosaic.version = 11 : i64} {
  func.func @_qnet_kernel(%arg0: memref<8x16xf32, #tpu.memory_space<vmem>>, %arg1: memref<16x256xf32, #tpu.memory_space<vmem>>, %arg2: memref<1x256xf32, #tpu.memory_space<vmem>>, %arg3: memref<256x128xf32, #tpu.memory_space<vmem>>, %arg4: memref<1x128xf32, #tpu.memory_space<vmem>>, %arg5: memref<128x128xf32, #tpu.memory_space<vmem>>, %arg6: memref<1x128xf32, #tpu.memory_space<vmem>>, %arg7: memref<128x4xf32, #tpu.memory_space<vmem>>, %arg8: memref<1x4xf32, #tpu.memory_space<vmem>>, %arg9: memref<8x4xf32, #tpu.memory_space<vmem>>) attributes {dimension_semantics = [], scalar_prefetch = 0 : i64, scratch_operands = 0 : i64, tpu.core_type = #tpu.core_type<tc>} {
    %c0 = arith.constant 0 : index
    %c0_0 = arith.constant 0 : index
    %0 = vector.load %arg0[%c0, %c0_0] : memref<8x16xf32, #tpu.memory_space<vmem>>, vector<8x16xf32>
    %c0_1 = arith.constant 0 : index
    %c0_2 = arith.constant 0 : index
    %1 = vector.load %arg1[%c0_1, %c0_2] : memref<16x256xf32, #tpu.memory_space<vmem>>, vector<16x256xf32>
    %cst = arith.constant dense<0.000000e+00> : vector<8x256xf32>
    %2 = tpu.matmul %0, %1, %cst {dimension_numbers = #tpu.dot_dimension_numbers<[1], [0], [0], [1], [0, 0, 1, 1], [], []>} : vector<8x16xf32>, vector<16x256xf32>, vector<8x256xf32> -> vector<8x256xf32>
    %c0_3 = arith.constant 0 : index
    %c0_4 = arith.constant 0 : index
    %3 = vector.load %arg2[%c0_3, %c0_4] : memref<1x256xf32, #tpu.memory_space<vmem>>, vector<1x256xf32>
    %4 = vector.broadcast %3 : vector<1x256xf32> to vector<8x256xf32>
    %5 = arith.addf %2, %4 : vector<8x256xf32>
    %cst_5 = arith.constant 0.000000e+00 : f32
    %6 = vector.broadcast %cst_5 : f32 to vector<8x256xf32>
    %7 = arith.maximumf %5, %6 : vector<8x256xf32>
    %c0_6 = arith.constant 0 : index
    %c0_7 = arith.constant 0 : index
    %8 = vector.load %arg3[%c0_6, %c0_7] : memref<256x128xf32, #tpu.memory_space<vmem>>, vector<256x128xf32>
    %cst_8 = arith.constant dense<0.000000e+00> : vector<8x128xf32>
    %9 = tpu.matmul %7, %8, %cst_8 {dimension_numbers = #tpu.dot_dimension_numbers<[1], [0], [0], [1], [0, 0, 1, 1], [], []>} : vector<8x256xf32>, vector<256x128xf32>, vector<8x128xf32> -> vector<8x128xf32>
    %c0_9 = arith.constant 0 : index
    %c0_10 = arith.constant 0 : index
    %10 = vector.load %arg4[%c0_9, %c0_10] : memref<1x128xf32, #tpu.memory_space<vmem>>, vector<1x128xf32>
    %11 = vector.broadcast %10 : vector<1x128xf32> to vector<8x128xf32>
    %12 = arith.addf %9, %11 : vector<8x128xf32>
    %cst_11 = arith.constant 0.000000e+00 : f32
    %13 = vector.broadcast %cst_11 : f32 to vector<8x128xf32>
    %14 = arith.maximumf %12, %13 : vector<8x128xf32>
    %c0_12 = arith.constant 0 : index
    %c0_13 = arith.constant 0 : index
    %15 = vector.load %arg5[%c0_12, %c0_13] : memref<128x128xf32, #tpu.memory_space<vmem>>, vector<128x128xf32>
    %cst_14 = arith.constant dense<0.000000e+00> : vector<8x128xf32>
    %16 = tpu.matmul %14, %15, %cst_14 {dimension_numbers = #tpu.dot_dimension_numbers<[1], [0], [0], [1], [0, 0, 1, 1], [], []>} : vector<8x128xf32>, vector<128x128xf32>, vector<8x128xf32> -> vector<8x128xf32>
    %c0_15 = arith.constant 0 : index
    %c0_16 = arith.constant 0 : index
    %17 = vector.load %arg6[%c0_15, %c0_16] : memref<1x128xf32, #tpu.memory_space<vmem>>, vector<1x128xf32>
    %18 = vector.broadcast %17 : vector<1x128xf32> to vector<8x128xf32>
    %19 = arith.addf %16, %18 : vector<8x128xf32>
    %cst_17 = arith.constant 0.000000e+00 : f32
    %20 = vector.broadcast %cst_17 : f32 to vector<8x128xf32>
    %21 = arith.maximumf %19, %20 : vector<8x128xf32>
    %c0_18 = arith.constant 0 : index
    %c0_19 = arith.constant 0 : index
    %22 = vector.load %arg7[%c0_18, %c0_19] : memref<128x4xf32, #tpu.memory_space<vmem>>, vector<128x4xf32>
    %cst_20 = arith.constant dense<0.000000e+00> : vector<8x4xf32>
    %23 = tpu.matmul %21, %22, %cst_20 {dimension_numbers = #tpu.dot_dimension_numbers<[1], [0], [0], [1], [0, 0, 1, 1], [], []>} : vector<8x128xf32>, vector<128x4xf32>, vector<8x4xf32> -> vector<8x4xf32>
    %c0_21 = arith.constant 0 : index
    %c0_22 = arith.constant 0 : index
    %24 = vector.load %arg8[%c0_21, %c0_22] : memref<1x4xf32, #tpu.memory_space<vmem>>, vector<1x4xf32>
    %25 = vector.broadcast %24 : vector<1x4xf32> to vector<8x4xf32>
    %26 = arith.addf %23, %25 : vector<8x4xf32>
    %c0_23 = arith.constant 0 : index
    %c0_24 = arith.constant 0 : index
    %27 = vector.load %arg9[%c0_23, %c0_24] : memref<8x4xf32, #tpu.memory_space<vmem>>, vector<8x4xf32>
    tpu.vector_store %arg9[%c0_23, %c0_24], %26 {strides = array<i32>} : memref<8x4xf32, #tpu.memory_space<vmem>>, vector<8x4xf32>,
    return
  }
}

</mosaic_0001>

<bundles_post_ra>
// kernel: tpu_custom_call.1
= control target key start
LH: loop header
LB: loop body
LE: loop exit
PB: predicated region body
PF: predicated region fallthrough
CT: control target
= control target key end

     0   :  { %14 = vsyncpa [#allocation3], 0  ;;  %s959_s0 = inlined_call_operand.vmem [shape: f32[8,16], index: 0, kind: input, shape index: {}]   ;;  %s960_s1 = inlined_call_operand.hbm [shape: f32[16,256], index: 1, kind: input, shape index: {}]   ;;  %s961_s2 = inlined_call_operand.vmem [shape: f32[1,256], index: 2, kind: input, shape index: {}]   ;;  %s962_s3 = inlined_call_operand.hbm [shape: f32[256,128], index: 3, kind: input, shape index: {}]   ;;  %s963_s4 = inlined_call_operand.vmem [shape: f32[1,128], index: 4, kind: input, shape index: {}]   ;;  %s964_s5 = inlined_call_operand.vmem [shape: f32[128,128], index: 5, kind: input, shape index: {}]   ;;  %s965_s6 = inlined_call_operand.vmem [shape: f32[1,128], index: 6, kind: input, shape index: {}]   ;;  %s966_s7 = inlined_call_operand.vmem [shape: f32[128,4], index: 7, kind: input, shape index: {}]   ;;  %s967_s8 = inlined_call_operand.vmem [shape: f32[1,4], index: 8, kind: input, shape index: {}]   ;;  %s968_s9 = inlined_call_operand.vmem [shape: f32[8,4], index: 9, kind: output, shape index: {}]  }
   0x1   :  { %15 = vsyncpa [#allocation5], 0  ;;  %s743_s30 = smov [#allocation2]   ;;  %s695_s13 = scalar_lea.hbm %s960_s1, 512 }
   0x2   :  { %s23_s10 = sshll.u32 %s743_s30, 4  ;;  %p696_p0 = scmp.ne.s32.totalorder %s960_s1, %s695_s13  ;;  %s24_s10 = int_to_ptr.vmem [resolvable:$true] %s23_s10 }
   0x3   :  { %p699_p1 = scmp.lt.u32.totalorder %s695_s13, %s960_s1 }
   0x5   :  { %p701_p2 = pnand %p699_p1, %p696_p0 }
   0x7   :  { %704 = shalt.err (!%p701_p2)
}
   0x8   :  { %s705_s18 = scalar_lea.vmem %s24_s10, 512  ;;  %p710_p4 = scmp.lt.s32.totalorder %s24_s10, %s24_s10 }
   0x9   :  { %p706_p3 = scmp.ne.s32.totalorder %s24_s10, %s705_s18  ;;  %p711_p5 = scmp.lt.s32.totalorder %s705_s18, %s705_s18 }
   0xb   :  { %p712_p6 = por %p711_p5, %p710_p4 }
   0xd   :  { %p713_p7 = pnand %p712_p6, %p706_p3 }
   0xf   :  { %716 = shalt.err (!%p713_p7)
}
  0x10   :  { %s744_s19 = smov 256   ;;  %s745_s20 = smov 16  }
  0x11   :  { %29 = dma.hbm_to_vmem [thread:$0]  %s960_s1, 512, %s24_s10, [#allocation3], %s744_s19, %s744_s19, %s745_s20  }
  0x12   :  { %s746_s23 = smov [#allocation4]   ;;  %s717_s27 = scalar_lea.hbm %s962_s3, 4096 }
  0x13   :  { %s37_s24 = sshll.u32 %s746_s23, 4  ;;  %p718_p8 = scmp.ne.s32.totalorder %s962_s3, %s717_s27  ;;  %s38_s24 = int_to_ptr.vmem [resolvable:$true] %s37_s24 }
  0x14   :  { %p721_p9 = scmp.lt.u32.totalorder %s717_s27, %s962_s3 }
  0x16   :  { %p723_p10 = pnand %p721_p9, %p718_p8 }
  0x18   :  { %726 = shalt.err (!%p723_p10)
}
  0x19   :  { %s727_s12 = scalar_lea.vmem %s38_s24, 4096  ;;  %p732_p12 = scmp.lt.s32.totalorder %s38_s24, %s38_s24 }
  0x1a   :  { %p728_p11 = scmp.ne.s32.totalorder %s38_s24, %s727_s12  ;;  %p733_p13 = scmp.lt.s32.totalorder %s727_s12, %s727_s12 }
  0x1c   :  { %p734_p0 = por %p733_p13, %p732_p12 }
  0x1e   :  { %p735_p1 = pnand %p734_p0, %p728_p11 }
  0x20   :  { %738 = shalt.err (!%p735_p1)
}
  0x21   :  { %s747_s1 = smov 128   ;;  %s748_s10 = smov 8  }
  0x22   :  { %43 = dma.hbm_to_vmem [thread:$0]  %s962_s3, 4096, %s38_s24, [#allocation5], %s747_s1, %s747_s1, %s748_s10  }
  0x23   :  { %739 = dma.done.wait [#allocation3], 512  }
  0x24   :  { %740 = vsyncadd [#allocation3], 4294966784 }
  0x25   :  { %741 = dma.done.wait [#allocation5], 4096  }
  0x26   :  { %742 = vsyncadd [#allocation5], 4294963200  ;;  %v749_v0 = vmov 0.0   ;;  %v62_v1 = vld [vmem:[#allocation2 + $0x8] sm:$0xff]  ;;  %v64_v2 = vld [vmem:[#allocation2 + $0x18] sm:$0xff]  ;;  %vm77_vm0 = vcmask 130048  }
  0x27   :  { %145 = vmatprep.mubr.f32.mxu0 %v749_v0  ;;  %v61_v3 = vld [vmem:[#allocation2] sm:$0xff]  ;;  %v602_v4 = vpack.c.bf16 %v64_v2, %v62_v1  ;;  %v63_v5 = vld [vmem:[#allocation2 + $0x10] sm:$0xff]  ;;  %v171_v9 = vld [vmem:[#allocation4 + $0x88] sm:$0xff]  ;;  %v750_v59 = vmov 0.0|0.0   ;;  %vm751_vm1 = vmmov 0   ;;  %vm451_vm2 = vcmask 31744  }
  0x28   :  { %v170_v6 = vld [vmem:[#allocation4 + $0x80] sm:$0xff]  ;;  %v604_v7 = vpack.c.bf16 %v63_v5, %v61_v3  ;;  %v155_v11 = vld [vmem:[#allocation4 + $0x8] sm:$0xff]  ;;  %v172_v14 = vld [vmem:[#allocation4 + $0x90] sm:$0xff] }
  0x29   :  { %v60_v8 = vld [vmem:[%s959_s0] sm:$0xff]  ;;  %603 = vmatprep.subr.bf16.mxu0 %v602_v4  ;;  %v606_v12 = vpack.c.bf16 %v171_v9, %v170_v6  ;;  %v173_v15 = vld [vmem:[#allocation4 + $0x98] sm:$0xff]  ;;  %v156_v16 = vld [vmem:[#allocation4 + $0x10] sm:$0xff] }
  0x2a   :  { %v154_v10 = vld [vmem:[#allocation4] sm:$0xff]  ;;  %605 = vmatpush1.bf16.msra.mxu0 %v604_v7  ;;  %v610_v17 = vpack.c.bf16 %v173_v15, %v172_v14  ;;  %v157_v18 = vld [vmem:[#allocation4 + $0x18] sm:$0xff]  ;;  %v175_v20 = vld [vmem:[#allocation4 + $0xa8] sm:$0xff] }
  0x2b   :  { %v608_v13 = vpack.c.bf16 %v155_v11, %v154_v10  ;;  %v174_v19 = vld [vmem:[#allocation4 + $0xa0] sm:$0xff]  ;;  %607 = vmatprep.subr.bf16.mxu1 %v606_v12  ;;  %v612_v21 = vpack.c.bf16 %v157_v18, %v156_v16  ;;  %v159_v24 = vld [vmem:[#allocation4 + $0x28] sm:$0xff]  ;;  %v176_v25 = vld [vmem:[#allocation4 + $0xb0] sm:$0xff]  ;;  %638 = vmatprep.subr.bf16.mxu0 %v750_v59  ;;  %v67_v12 = vlaneseq }
  0x2c   :  { %v614_v22 = vpack.c.bf16 %v175_v20, %v174_v19  ;;  %v158_v23 = vld [vmem:[#allocation4 + $0x20] sm:$0xff]  ;;  %v177_v26 = vld [vmem:[#allocation4 + $0xb8] sm:$0xff]  ;;  %v160_v29 = vld [vmem:[#allocation4 + $0x30] sm:$0xff] }
  0x2d   :  { %609 = vmatpush3.bf16.msra.mxu1 %v608_v13  ;;  %459 = vmatmul.mubr.msk.f32.vlgmr.msra.gmra.mrb[0].mxu0 %vm77_vm0, %v60_v8  ;;  %v616_v27 = vpack.c.bf16 %v159_v24, %v158_v23  ;;  %v618_v28 = vpack.c.bf16 %v177_v26, %v176_v25  ;;  %v161_v30 = vld [vmem:[#allocation4 + $0x38] sm:$0xff]  ;;  %v178_v31 = vld [vmem:[#allocation4 + $0xc0] sm:$0xff]  ;;  %v179_v32 = vld [vmem:[#allocation4 + $0xc8] sm:$0xff]  ;;  %v68_v13 = vshrl.u32 %v67_v12, 7 }
  0x2e   :  { %611 = vmatprep.subr.bf16.mxu1 %v610_v17  ;;  %v620_v33 = vpack.c.bf16 %v161_v30, %v160_v29  ;;  %v622_v34 = vpack.c.bf16 %v179_v32, %v178_v31  ;;  %v162_v35 = vld [vmem:[#allocation4 + $0x40] sm:$0xff]  ;;  %v163_v36 = vld [vmem:[#allocation4 + $0x48] sm:$0xff]  ;;  %v180_v37 = vld [vmem:[#allocation4 + $0xd0] sm:$0xff]  ;;  %564 = vmatprep.mubr.msk.f32.mxu0 %vm751_vm1, %v749_v0 }
  0x2f   :  { %v181_v38 = vld [vmem:[#allocation4 + $0xd8] sm:$0xff]  ;;  %v624_v39 = vpack.c.bf16 %v163_v36, %v162_v35  ;;  %v164_v41 = vld [vmem:[#allocation4 + $0x50] sm:$0xff]  ;;  %v182_v43 = vld [vmem:[#allocation4 + $0xe0] sm:$0xff]  ;;  %v69_v14 = vsub.s32 0, %v68_v13  ;;  %v73_v16 = vsub.s32 1, %v68_v13 }
  0x30   :  { %v626_v40 = vpack.c.bf16 %v181_v38, %v180_v37  ;;  %v165_v42 = vld [vmem:[#allocation4 + $0x58] sm:$0xff]  ;;  %v183_v44 = vld [vmem:[#allocation4 + $0xe8] sm:$0xff]  ;;  %v166_v47 = vld [vmem:[#allocation4 + $0x60] sm:$0xff] }
  0x31   :  { %613 = vmatpush3.bf16.msra.mxu1 %v612_v21  ;;  %v628_v45 = vpack.c.bf16 %v165_v42, %v164_v41  ;;  %v630_v46 = vpack.c.bf16 %v183_v44, %v182_v43  ;;  %v167_v48 = vld [vmem:[#allocation4 + $0x68] sm:$0xff]  ;;  %v184_v50 = vld [vmem:[#allocation4 + $0xf0] sm:$0xff]  ;;  %v185_v51 = vld [vmem:[#allocation4 + $0xf8] sm:$0xff] }
  0x32   :  { %615 = vmatprep.subr.bf16.mxu1 %v614_v22  ;;  %v632_v49 = vpack.c.bf16 %v167_v48, %v166_v47  ;;  %v634_v52 = vpack.c.bf16 %v185_v51, %v184_v50  ;;  %v168_v53 = vld [vmem:[#allocation4 + $0x70] sm:$0xff]  ;;  %v169_v54 = vld [vmem:[#allocation4 + $0x78] sm:$0xff]  ;;  %v264_v56 = vld [vmem:[%s964_s5] sm:$0xff] }
  0x33   :  { %v636_v55 = vpack.c.bf16 %v169_v54, %v168_v53  ;;  %v265_v57 = vld [vmem:[%s964_s5 + $0x8] sm:$0xff]  ;;  %v266_v58 = vld [vmem:[%s964_s5 + $0x10] sm:$0xff]  ;;  %v267_v61 = vld [vmem:[%s964_s5 + $0x18] sm:$0xff] }
  0x34   :  { %v639_v60 = vpack.c.bf16 %v265_v57, %v264_v56  ;;  %v642_v62 = vpack.c.bf16 %v267_v61, %v266_v58  ;;  %v268_v63 = vld [vmem:[%s964_s5 + $0x20] sm:$0xff]  ;;  %v269_v1 = vld [vmem:[%s964_s5 + $0x28] sm:$0xff]  ;;  %v270_v3 = vld [vmem:[%s964_s5 + $0x30] sm:$0xff] }
  0x35   :  { %617 = vmatpush3.bf16.msra.mxu1 %v616_v27  ;;  %v645_v2 = vpack.c.bf16 %v269_v1, %v268_v63  ;;  %v271_v4 = vld [vmem:[%s964_s5 + $0x38] sm:$0xff]  ;;  %v272_v6 = vld [vmem:[%s964_s5 + $0x40] sm:$0xff]  ;;  %v273_v7 = vld [vmem:[%s964_s5 + $0x48] sm:$0xff] }
  0x36   :  { %619 = vmatprep.subr.bf16.mxu1 %v618_v28  ;;  %640 = vmatpush3.bf16.msra.mxu0 %v639_v60  ;;  %v648_v5 = vpack.c.bf16 %v271_v4, %v270_v3  ;;  %v651_v8 = vpack.c.bf16 %v273_v7, %v272_v6  ;;  %v274_v9 = vld [vmem:[%s964_s5 + $0x50] sm:$0xff]  ;;  %v275_v10 = vld [vmem:[%s964_s5 + $0x58] sm:$0xff]  ;;  %v65_v15 = vld [vmem:[%s961_s2] sm:$0x3] }
  0x37   :  { %641 = vmatprep.subr.bf16.mxu0 %v750_v59  ;;  %v654_v11 = vpack.c.bf16 %v275_v10, %v274_v9  ;;  %v70_v17 = vrot.slane %v65_v15, %v69_v14  ;;  %v74_v18 = vrot.slane %v65_v15, %v73_v16  ;;  %v276_v25 = vld [vmem:[%s964_s5 + $0x60] sm:$0xff]  ;;  %v277_v26 = vld [vmem:[%s964_s5 + $0x68] sm:$0xff]  ;;  %v278_v28 = vld [vmem:[%s964_s5 + $0x70] sm:$0xff] }
  0x38   :  { %v657_v27 = vpack.c.bf16 %v277_v26, %v276_v25  ;;  %v279_v29 = vld [vmem:[%s964_s5 + $0x78] sm:$0xff]  ;;  %v358_v31 = vld [vmem:[%s966_s7] sm:$0xff]  ;;  %v359_v32 = vld [vmem:[%s966_s7 + $0x8] sm:$0xff] }
  0x39   :  { %621 = vmatpush3.bf16.msra.mxu1 %v620_v33  ;;  %v660_v30 = vpack.c.bf16 %v279_v29, %v278_v28  ;;  %v360_v33 = vld [vmem:[%s966_s7 + $0x10] sm:$0xff]  ;;  %v361_v35 = vld [vmem:[%s966_s7 + $0x18] sm:$0xff]  ;;  %v363_v37 = vld [vmem:[%s966_s7 + $0x28] sm:$0xff] }
  0x3a   :  { %623 = vmatprep.subr.bf16.mxu1 %v622_v34  ;;  %643 = vmatpush3.bf16.msra.mxu0 %v642_v62  ;;  %v663_v34 = vpack.c.bf16 %v359_v32, %v358_v31  ;;  %v666_v36 = vpack.c.bf16 %v361_v35, %v360_v33  ;;  %v366_v42 = vld [vmem:[%s966_s7 + $0x40] sm:$0xff]  ;;  %v367_v43 = vld [vmem:[%s966_s7 + $0x48] sm:$0xff]  ;;  %v372_v57 = vld [vmem:[%s966_s7 + $0x70] sm:$0xff] }
  0x3b   :  { %644 = vmatprep.subr.bf16.mxu0 %v750_v59  ;;  %v675_v44 = vpack.c.bf16 %v367_v43, %v366_v42  ;;  %v370_v48 = vld [vmem:[%s966_s7 + $0x60] sm:$0xff]  ;;  %v373_v58 = vld [vmem:[%s966_s7 + $0x78] sm:$0xff] }
  0x3c   :  { %v684_v60 = vpack.c.bf16 %v373_v58, %v372_v57 }
  0x3d   :  { %625 = vmatpush3.bf16.msra.mxu1 %v624_v39  ;;  %v364_v39 = vld [vmem:[%s966_s7 + $0x30] sm:$0xff] }
  0x3e   :  { %627 = vmatprep.subr.bf16.mxu1 %v626_v40  ;;  %646 = vmatpush3.bf16.msra.mxu0 %v645_v2  ;;  %v365_v40 = vld [vmem:[%s966_s7 + $0x38] sm:$0xff]  ;;  %v462_v2 = vld [vmem:[%s967_s8] ss:$0 sm:$0xff] }
  0x3f   :  { %647 = vmatprep.subr.bf16.mxu0 %v750_v59  ;;  %v672_v41 = vpack.c.bf16 %v365_v40, %v364_v39 }
  0x41   :  { %629 = vmatpush3.bf16.msra.mxu1 %v628_v45  ;;  %v368_v45 = vld [vmem:[%s966_s7 + $0x50] sm:$0xff] }
  0x42   :  { %631 = vmatprep.subr.bf16.mxu1 %v630_v46  ;;  %649 = vmatpush3.bf16.msra.mxu0 %v648_v5  ;;  %v369_v46 = vld [vmem:[%s966_s7 + $0x58] sm:$0xff] }
  0x43   :  { %650 = vmatprep.subr.bf16.mxu0 %v750_v59  ;;  %v678_v47 = vpack.c.bf16 %v369_v46, %v368_v45 }
  0x45   :  { %633 = vmatpush3.bf16.msra.mxu1 %v632_v49  ;;  %v371_v49 = vld [vmem:[%s966_s7 + $0x68] sm:$0xff] }
  0x46   :  { %635 = vmatprep.subr.bf16.mxu1 %v634_v52  ;;  %652 = vmatpush3.bf16.msra.mxu0 %v651_v8  ;;  %v681_v50 = vpack.c.bf16 %v371_v49, %v370_v48  ;;  %v460_v52 = vld [vmem:[%s963_s4] ss:$0 sm:$0xff] }
  0x47   :  { %653 = vmatprep.subr.bf16.mxu0 %v750_v59 }
  0x49   :  { %637 = vmatpush3.bf16.msra.mxu1 %v636_v55 }
  0x4a   :  { %662 = vmatprep.subr.bf16.mxu1 %v750_v59  ;;  %655 = vmatpush3.bf16.msra.mxu0 %v654_v11 }
  0x4b   :  { %656 = vmatprep.subr.bf16.mxu0 %v750_v59 }
  0x4e   :  { %658 = vmatpush3.bf16.msra.mxu0 %v657_v27 }
  0x4f   :  { %659 = vmatprep.subr.bf16.mxu0 %v750_v59 }
  0x52   :  { %661 = vmatpush3.bf16.msra.mxu0 %v660_v30 }
 0x100   :  { %v147_v19 = vpop.f32.mrb[0].mxu0 }
 0x101   :  { %v148_v20 = vadd.f32 %v147_v19, %v70_v17  ;;  %v149_v21 = vpop.f32.mrb[1].mxu0 }
 0x102   :  { %v150_v22 = vadd.f32 %v149_v21, %v74_v18 }
 0x103   :  { %v152_v24 = vmax.f32 %v148_v20, 0.0 }
 0x104   :  { %v153_v23 = vmax.f32 %v150_v22, 0.0 }
 0x106   :  { %257 = vmatprep.mubr.f32.mxu1 %v153_v23 }
 0x107   :  { %258 = vmatmul.mubr.f32.vlgmr.msra.gmra.mrb[0].mxu1 %v152_v24 }
 0x108   :  { %599 = vmatprep.mubr.msk.f32.mxu1 %vm751_vm1, %v749_v0  ;;  %664 = vmatpush3.bf16.msra.mxu1 %v663_v34  ;;  %v362_v0 = vld [vmem:[%s966_s7 + $0x20] sm:$0xff] }
 0x109   :  { %665 = vmatprep.subr.bf16.mxu1 %v750_v59  ;;  %v669_v38 = vpack.c.bf16 %v363_v37, %v362_v0 }
 0x10c   :  { %667 = vmatpush3.bf16.msra.mxu1 %v666_v36 }
 0x10d   :  { %668 = vmatprep.subr.bf16.mxu1 %v750_v59 }
 0x110   :  { %670 = vmatpush3.bf16.msra.mxu1 %v669_v38 }
 0x111   :  { %671 = vmatprep.subr.bf16.mxu1 %v750_v59 }
 0x114   :  { %673 = vmatpush3.bf16.msra.mxu1 %v672_v41 }
 0x115   :  { %674 = vmatprep.subr.bf16.mxu1 %v750_v59 }
 0x118   :  { %676 = vmatpush3.bf16.msra.mxu1 %v675_v44 }
 0x119   :  { %677 = vmatprep.subr.bf16.mxu1 %v750_v59 }
 0x11c   :  { %679 = vmatpush3.bf16.msra.mxu1 %v678_v47 }
 0x11d   :  { %680 = vmatprep.subr.bf16.mxu1 %v750_v59 }
 0x120   :  { %682 = vmatpush3.bf16.msra.mxu1 %v681_v50 }
 0x121   :  { %683 = vmatprep.subr.bf16.mxu1 %v750_v59  ;;  %v461_v59 = vld [vmem:[%s965_s6] ss:$0 sm:$0xff] }
 0x124   :  { %685 = vmatpush3.bf16.msra.mxu1 %v684_v60 }
 0x1da   :  { %v495_v51 = vpop.f32.mrb[0].mxu1 }
 0x1db   :  { %v496_v53 = vpop.f32.mrb[1].mxu1 }
 0x1dc   :  { %v497_v54 = vadd.f32 %v496_v53, %v495_v51 }
 0x1de   :  { %v260_v55 = vadd.f32 %v497_v54, %v460_v52 }
 0x1e0   :  { %v263_v56 = vmax.f32 %v260_v55, 0.0 }
 0x1e2   :  { %565 = vmatmul.mubr.f32.vlgmr.msra.gmra.mrb[2].mxu0 %v263_v56 }
 0x2b5   :  { %v353_v61 = vpop.f32.mrb[2].mxu0 }
 0x2b6   :  { %v354_v62 = vadd.f32 %v461_v59, %v353_v61  ;;  %v566_v63 = vpop.f32.mrb[3].mxu0 }
 0x2b8   :  { %v357_v1 = vmax.f32 %v354_v62, 0.0 }
 0x2ba   :  { %600 = vmatmul.mubr.f32.vlgmr.msra.gmra.mrb[2].mxu1 %v357_v1 }
 0x38d   :  { %v447_v3 = vpop.f32.mrb[2].mxu1 }
 0x38e   :  { %v448_v4 = vadd.f32 %v462_v2, %v447_v3  ;;  %v601_v5 = vpop.f32.mrb[3].mxu1 }
 0x390   :  { %452 = vst.msk [vmem:[%s968_s9] sm:$0xff] %vm451_vm2, %v448_v4 }
 0x391   :  { %457 = vsyncpa [#allocation3], 1 }
 0x392   :  { %458 = vsyncpa [#allocation5], 1 }

</bundles_post_ra>
